<compile_context>
chip_gen: v7x
topology: tpu7x:2x2x1
jax: 0.10.0
libtpu: 0.0.40
codegen_flags: <defaults>
</compile_context>

<pallas_src>
import functools

import jax
import jax.numpy as jnp
from jax.experimental import pallas as pl
from jax.experimental.pallas import tpu as pltpu


def _vmem_limit_bytes():
    """~3/4 of physical VMEM: ~96 MiB on v5e/v6e, ~48 MiB on v7x."""
    try:
        cap = getattr(pltpu.get_tpu_info(), "vmem_capacity_bytes", None)
    except Exception:
        cap = None
    if not cap:
        cap = 64 * 1024 * 1024
    return int(min(cap * 3 // 4, 112 * 1024 * 1024))


# ------------------------------------------------------------------- kernel --
def _fused_kernel(x_ref, w1_ref, b1_ref, w2_ref, b2_ref, ms_ref, wfc_ref,
                  bfc_ref, o_ref, pool_scr, *, wh, pp, p2):
    """One image per grid step.

    x_ref:   (1, Pimg, 12) bf16  pixel-unshuffled image, lanes = 4 phases x 3 ch
    w1_ref:  (48, 128)     bf16  conv1 weight scattered for the fused pool matmul
    b1_ref:  (1, 32)       f32
    w2_ref:  (288, 64)     bf16  conv2 weight, rows ordered (dy, dx, c)
    b2_ref:  (1, 64)       f32
    ms_ref:  (P2, 1)       f32   valid-column mask / (H2*W2)
    wfc_ref: (1, 64) f32   bfc_ref: (1, 1) f32   o_ref: (1, 1, 1) f32
    pool_scr: VMEM (Pp, 32) bf16  pooled conv1 activation (flat, row pitch Wh)
    """
    # ---- conv1 + ReLU + maxpool: a single MXU matmul over the K-concat of the
    # 4 half-res shifts (0, +1, +Wh, +Wh+1) of the 12 phase channels.
    lhs1 = jnp.concatenate(
        [x_ref[0, pl.ds(s, pp), :] for s in (0, 1, wh, wh + 1)], axis=-1)
    y1 = jnp.dot(lhs1, w1_ref[...], preferred_element_type=jnp.float32)
    # y1 lanes = 4 pool taps x 32 channels; reduce the 4 groups with rolls
    # (direction-agnostic for a max reduction), then bias + ReLU.
    y1 = jnp.maximum(y1, pltpu.roll(y1, 64, 1))
    y1 = jnp.maximum(y1, pltpu.roll(y1, 32, 1))
    pooled = jnp.maximum(y1[:, :32] + b1_ref[...], 0.0)
    pool_scr[...] = pooled.astype(pool_scr.dtype)

    # ---- conv2: K-concat the 9 taps in VMEM -> one (P2, 288) @ (288, 64).
    shifts2 = tuple(dy * wh + dx for dy in range(3) for dx in range(3))
    lhs2 = jnp.concatenate(
        [pool_scr[pl.ds(s, p2), :] for s in shifts2], axis=-1)
    y2 = jnp.dot(lhs2, w2_ref[...], preferred_element_type=jnp.float32)
    y2 = jnp.maximum(y2 + b2_ref[...], 0.0)

    # ---- masked global mean (wrap-around columns zeroed; every row of the
    # pooled scratch is written from finite data, so 0 * x is exactly 0),
    # then the 64->1 head as a VPU/XLU reduction + sigmoid.
    avg = jnp.sum(y2 * ms_ref[...], axis=0, keepdims=True)           # (1, 64)
    logit = jnp.sum(avg * wfc_ref[...], axis=1, keepdims=True) + bfc_ref[...]
    o_ref[...] = jax.nn.sigmoid(logit).reshape(o_ref.shape)


# ------------------------------------------------------------ weight fusing --
def _conv1_weight48(w1_oihw):
    """Scatter the (32, 3, 3, 3) conv1 weight into the (48, 128) fused matrix.

    lhs lane layout : 4 half-res shifts (0, +1, +Wh, +Wh+1) x 12 phase channels
                      (qy, qx, c).
    out lane layout : 4 pool taps (ty, tx) x 32 output channels.
    """
    o = w1_oihw.shape[0]                                   # 32
    w48 = jnp.zeros((48, 4 * o), jnp.float32)
    for ty in range(2):
        for tx in range(2):
            t = 2 * ty + tx
            for dy in range(3):
                for dx in range(3):
                    sy, qy = (ty + dy) // 2, (ty + dy) % 2
                    sx, qx = (tx + dx) // 2, (tx + dx) % 2
                    row = 12 * (2 * sy + sx) + 3 * (2 * qy + qx)
                    blk = jnp.transpose(w1_oihw[:, :, dy, dx])     # (c=3, o=32)
                    w48 = w48.at[row:row + 3, o * t:o * (t + 1)].set(blk)
    return w48.astype(jnp.bfloat16)


# ------------------------------------------------------------------ forward --
def init_params(key):
    k1, k2, k3, k4, k5, k6 = jax.random.split(key, 6)
    return {
        "conv1_w": 0.05 * jax.random.normal(k1, (32, 3, 3, 3), jnp.float32),
        "conv1_b": 0.05 * jax.random.normal(k2, (32,), jnp.float32),
        "conv2_w": 0.05 * jax.random.normal(k3, (64, 32, 3, 3), jnp.float32),
        "conv2_b": 0.05 * jax.random.normal(k4, (64,), jnp.float32),
        "fc_w":    0.05 * jax.random.normal(k5, (1, 64), jnp.float32),  # (out, in)
        "fc_b":    0.05 * jax.random.normal(k6, (1,), jnp.float32),
    }


def video_classifier_forward(params, x_nchw):
    """x_nchw: (N, 3, H, W) float32 -> (N, 1) float32."""
    x = jnp.transpose(x_nchw, (0, 2, 3, 1)).astype(jnp.float32)       # NHWC
    n, h, w, _ = x.shape
    he, we = (h // 2) * 2, (w // 2) * 2       # even-truncate (border never used)
    hh, wh = he // 2, we // 2                 # half-res grid
    hp, wp = hh - 1, wh - 1                   # conv1(valid) + maxpool(2) output
    h2, w2 = hp - 2, wp - 2                   # conv2 output
    assert h2 >= 1 and w2 >= 1, "input spatial size too small"

    # ---- pixel-unshuffle (space-to-depth 2x2): the only wrapper-side image
    # pass (~raw-image bytes).  Lane order per half-res pixel: (qy, qx, c).
    xp = x[:, :he, :we, :].reshape(n, hh, 2, wh, 2, 3)
    xp = jnp.transpose(xp, (0, 1, 3, 2, 4, 5)).reshape(n, hh * wh, 12)
    pimg = (hh + 2) * wh                      # two zero pad rows for shifted reads
    xp = jnp.pad(xp, ((0, 0), (0, pimg - hh * wh), (0, 0))).astype(jnp.bfloat16)

    pp = hh * wh                              # pooled span (pitch Wh; cols >= Wp unused)
    p2 = h2 * wh                              # conv2 span  (pitch Wh; cols >= W2 masked)

    w1 = _conv1_weight48(params["conv1_w"])                           # (48, 128)
    b1 = params["conv1_b"].reshape(1, 32).astype(jnp.float32)
    w2m = jnp.transpose(params["conv2_w"], (2, 3, 1, 0)).reshape(288, 64)
    w2m = w2m.astype(jnp.bfloat16)
    b2 = params["conv2_b"].reshape(1, 64).astype(jnp.float32)
    cols = jnp.arange(p2, dtype=jnp.int32) % wh
    mask = jnp.where(cols < w2, 1.0 / (h2 * w2), 0.0)
    mask = mask.reshape(p2, 1).astype(jnp.float32)
    wfc = params["fc_w"].reshape(1, 64).astype(jnp.float32)
    bfc = params["fc_b"].reshape(1, 1).astype(jnp.float32)

    kernel = functools.partial(_fused_kernel, wh=wh, pp=pp, p2=p2)
    out = pl.pallas_call(
        kernel,
        out_shape=jax.ShapeDtypeStruct((n, 1, 1), jnp.float32),
        grid_spec=pltpu.PrefetchScalarGridSpec(
            num_scalar_prefetch=0,
            grid=(n,),
            in_specs=[
                pl.BlockSpec((1, pimg, 12), lambda i: (i, 0, 0)),
                pl.BlockSpec((48, 128), lambda i: (0, 0)),
                pl.BlockSpec((1, 32), lambda i: (0, 0)),
                pl.BlockSpec((288, 64), lambda i: (0, 0)),
                pl.BlockSpec((1, 64), lambda i: (0, 0)),
                pl.BlockSpec((p2, 1), lambda i: (0, 0)),
                pl.BlockSpec((1, 64), lambda i: (0, 0)),
                pl.BlockSpec((1, 1), lambda i: (0, 0)),
            ],
            out_specs=pl.BlockSpec((1, 1, 1), lambda i: (i, 0, 0)),
            scratch_shapes=[pltpu.VMEM((pp, 32), jnp.bfloat16)],
        ),
        compiler_params=pltpu.CompilerParams(
            dimension_semantics=("parallel",),
            vmem_limit_bytes=_vmem_limit_bytes(),
        ),
    )(xp, w1, b1, w2m, b2, mask, wfc, bfc)
    return out.reshape(n, 1)


# ------------------------------------------------------------- pure-JAX ref --
def _im2col(x_nhwc, kh, kw):
    n, h, w, c = x_nhwc.shape
    ho, wo = h - kh + 1, w - kw + 1
    cols = [x_nhwc[:, dy:dy + ho, dx:dx + wo, :]
            for dy in range(kh) for dx in range(kw)]
    return jnp.concatenate(cols, axis=-1), ho, wo


def _conv_w_to_mat(w_oihw):
    o, i, kh, kw = w_oihw.shape
    return jnp.transpose(w_oihw, (2, 3, 1, 0)).reshape(kh * kw * i, o)


def _forward_ref(params, x_nchw):
    x = jnp.transpose(x_nchw, (0, 2, 3, 1)).astype(jnp.float32)
    n = x.shape[0]
    p1, ho, wo = _im2col(x, 3, 3)
    y1 = jnp.maximum(p1.reshape(-1, 27) @ _conv_w_to_mat(params["conv1_w"])
                     + params["conv1_b"], 0.0).reshape(n, ho, wo, 32)
    hp, wp = ho // 2, wo // 2
    y1 = y1[:, :2 * hp, :2 * wp, :].reshape(n, hp, 2, wp, 2, 32)
    y2 = jnp.max(y1, axis=(2, 4))
    pc, h2, w2 = _im2col(y2, 3, 3)
    y3 = jnp.maximum(pc.reshape(-1, 288) @ _conv_w_to_mat(params["conv2_w"])
                     + params["conv2_b"], 0.0)
    pooled = jnp.mean(y3.reshape(n, h2 * w2, 64), axis=1)
    return jax.nn.sigmoid(pooled @ params["fc_w"].T + params["fc_b"])


# --------------------------------------------------------------------- main --
if __name__ == "__main__":
    key = jax.random.PRNGKey(0)
    pkey, xkey = jax.random.split(key)
    params = init_params(pkey)

    x = jax.random.normal(xkey, (2, 3, 16, 16), jnp.float32)  # NCHW like PyTorch

    fwd = jax.jit(video_classifier_forward)
    out = jax.block_until_ready(fwd(params, x))

    ref = _forward_ref(params, x)
    assert out.shape == (2, 1), out.shape
    # bf16 MXU inputs with f32 accumulation vs. the pure-f32 reference.
    assert jnp.allclose(out, ref, atol=5e-3, rtol=0.0), (out, ref)

    print("KERNEL_OK")
</pallas_src>

<mosaic_0001>
module attributes {stable_mosaic.version = 11 : i64} {
  func.func @_fused_kernel(%arg0: i32, %arg1: memref<1x80x12xbf16, #tpu.memory_space<vmem>>, %arg2: memref<48x128xbf16, #tpu.memory_space<vmem>>, %arg3: memref<1x32xf32, #tpu.memory_space<vmem>>, %arg4: memref<288x64xbf16, #tpu.memory_space<vmem>>, %arg5: memref<1x64xf32, #tpu.memory_space<vmem>>, %arg6: memref<40x1xf32, #tpu.memory_space<vmem>>, %arg7: memref<1x64xf32, #tpu.memory_space<vmem>>, %arg8: memref<1x1xf32, #tpu.memory_space<vmem>>, %arg9: memref<1x1x1xf32, #tpu.memory_space<vmem>>, %arg10: memref<64x32xbf16, #tpu.memory_space<vmem>>) attributes {dimension_semantics = [#tpu.dimension_semantics<parallel>], iteration_bounds = array<i64: 2>, scalar_prefetch = 0 : i64, scratch_operands = 1 : i64, tpu.core_type = #tpu.core_type<tc>, window_params = [{transform_indices = @transform_0, window_bounds = array<i64: 1, 80, 12>}, {pipeline_mode = #tpu.pipeline_mode<synchronous>, transform_indices = @transform_1, window_bounds = array<i64: 48, 128>}, {pipeline_mode = #tpu.pipeline_mode<synchronous>, transform_indices = @transform_2, window_bounds = array<i64: 1, 32>}, {pipeline_mode = #tpu.pipeline_mode<synchronous>, transform_indices = @transform_3, window_bounds = array<i64: 288, 64>}, {pipeline_mode = #tpu.pipeline_mode<synchronous>, transform_indices = @transform_4, window_bounds = array<i64: 1, 64>}, {pipeline_mode = #tpu.pipeline_mode<synchronous>, transform_indices = @transform_5, window_bounds = array<i64: 40, 1>}, {pipeline_mode = #tpu.pipeline_mode<synchronous>, transform_indices = @transform_6, window_bounds = array<i64: 1, 64>}, {pipeline_mode = #tpu.pipeline_mode<synchronous>, transform_indices = @transform_7, window_bounds = array<i64: 1, 1>}, {transform_indices = @transform_8, window_bounds = array<i64: 1, 1, 1>}]} {
    %c0 = arith.constant 0 : index
    %c0_0 = arith.constant 0 : index
    %c0_1 = arith.constant 0 : index
    %0 = vector.load %arg1[%c0, %c0_0, %c0_1] : memref<1x80x12xbf16, #tpu.memory_space<vmem>>, vector<1x64x12xbf16>
    %1 = vector.shape_cast %0 : vector<1x64x12xbf16> to vector<64x12xbf16>
    %c0_2 = arith.constant 0 : index
    %c1 = arith.constant 1 : index
    %c0_3 = arith.constant 0 : index
    %2 = vector.load %arg1[%c0_2, %c1, %c0_3] : memref<1x80x12xbf16, #tpu.memory_space<vmem>>, vector<1x64x12xbf16>
    %3 = vector.shape_cast %2 : vector<1x64x12xbf16> to vector<64x12xbf16>
    %c0_4 = arith.constant 0 : index
    %c8 = arith.constant 8 : index
    %c0_5 = arith.constant 0 : index
    %4 = vector.load %arg1[%c0_4, %c8, %c0_5] : memref<1x80x12xbf16, #tpu.memory_space<vmem>>, vector<1x64x12xbf16>
    %5 = vector.shape_cast %4 : vector<1x64x12xbf16> to vector<64x12xbf16>
    %c0_6 = arith.constant 0 : index
    %c9 = arith.constant 9 : index
    %c0_7 = arith.constant 0 : index
    %6 = vector.load %arg1[%c0_6, %c9, %c0_7] : memref<1x80x12xbf16, #tpu.memory_space<vmem>>, vector<1x64x12xbf16>
    %7 = vector.shape_cast %6 : vector<1x64x12xbf16> to vector<64x12xbf16>
    %8 = tpu.concatenate %1, %3, %5, %7 in 1 : vector<64x12xbf16>, vector<64x12xbf16>, vector<64x12xbf16>, vector<64x12xbf16> -> vector<64x48xbf16>
    %c0_8 = arith.constant 0 : index
    %c0_9 = arith.constant 0 : index
    %9 = vector.load %arg2[%c0_8, %c0_9] : memref<48x128xbf16, #tpu.memory_space<vmem>>, vector<48x128xbf16>
    %cst = arith.constant dense<0.000000e+00> : vector<64x128xf32>
    %10 = tpu.matmul %8, %9, %cst {dimension_numbers = #tpu.dot_dimension_numbers<[1], [0], [0], [1], [0, 0, 1, 1], [], []>} : vector<64x48xbf16>, vector<48x128xbf16>, vector<64x128xf32> -> vector<64x128xf32>
    %c64_i32 = arith.constant 64 : i32
    %11 = tpu.dynamic_rotate %10 by %c64_i32 dim 1 : vector<64x128xf32>, i32 -> vector<64x128xf32>
    %12 = arith.maximumf %10, %11 : vector<64x128xf32>
    %c32_i32 = arith.constant 32 : i32
    %13 = tpu.dynamic_rotate %12 by %c32_i32 dim 1 : vector<64x128xf32>, i32 -> vector<64x128xf32>
    %14 = arith.maximumf %12, %13 : vector<64x128xf32>
    %15 = vector.extract_strided_slice %14 {offsets = [0, 0], sizes = [64, 32], strides = [1, 1]} : vector<64x128xf32> to vector<64x32xf32>
    %c0_10 = arith.constant 0 : index
    %c0_11 = arith.constant 0 : index
    %16 = vector.load %arg3[%c0_10, %c0_11] : memref<1x32xf32, #tpu.memory_space<vmem>>, vector<1x32xf32>
    %17 = vector.broadcast %16 : vector<1x32xf32> to vector<64x32xf32>
    %18 = arith.addf %15, %17 : vector<64x32xf32>
    %cst_12 = arith.constant 0.000000e+00 : f32
    %19 = vector.broadcast %cst_12 : f32 to vector<64x32xf32>
    %20 = arith.maximumf %18, %19 : vector<64x32xf32>
    %21 = arith.truncf %20 : vector<64x32xf32> to vector<64x32xbf16>
    %c0_13 = arith.constant 0 : index
    %c0_14 = arith.constant 0 : index
    %22 = vector.load %arg10[%c0_13, %c0_14] : memref<64x32xbf16, #tpu.memory_space<vmem>>, vector<64x32xbf16>
    tpu.vector_store %arg10[%c0_13, %c0_14], %21 {strides = array<i32>} : memref<64x32xbf16, #tpu.memory_space<vmem>>, vector<64x32xbf16>,
    %c0_15 = arith.constant 0 : index
    %c0_16 = arith.constant 0 : index
    %23 = vector.load %arg10[%c0_15, %c0_16] : memref<64x32xbf16, #tpu.memory_space<vmem>>, vector<40x32xbf16>
    %c1_17 = arith.constant 1 : index
    %c0_18 = arith.constant 0 : index
    %24 = vector.load %arg10[%c1_17, %c0_18] : memref<64x32xbf16, #tpu.memory_space<vmem>>, vector<40x32xbf16>
    %c2 = arith.constant 2 : index
    %c0_19 = arith.constant 0 : index
    %25 = vector.load %arg10[%c2, %c0_19] : memref<64x32xbf16, #tpu.memory_space<vmem>>, vector<40x32xbf16>
    %c8_20 = arith.constant 8 : index
    %c0_21 = arith.constant 0 : index
    %26 = vector.load %arg10[%c8_20, %c0_21] : memref<64x32xbf16, #tpu.memory_space<vmem>>, vector<40x32xbf16>
    %c9_22 = arith.constant 9 : index
    %c0_23 = arith.constant 0 : index
    %27 = vector.load %arg10[%c9_22, %c0_23] : memref<64x32xbf16, #tpu.memory_space<vmem>>, vector<40x32xbf16>
    %c10 = arith.constant 10 : index
    %c0_24 = arith.constant 0 : index
    %28 = vector.load %arg10[%c10, %c0_24] : memref<64x32xbf16, #tpu.memory_space<vmem>>, vector<40x32xbf16>
    %c16 = arith.constant 16 : index
    %c0_25 = arith.constant 0 : index
    %29 = vector.load %arg10[%c16, %c0_25] : memref<64x32xbf16, #tpu.memory_space<vmem>>, vector<40x32xbf16>
    %c17 = arith.constant 17 : index
    %c0_26 = arith.constant 0 : index
    %30 = vector.load %arg10[%c17, %c0_26] : memref<64x32xbf16, #tpu.memory_space<vmem>>, vector<40x32xbf16>
    %c18 = arith.constant 18 : index
    %c0_27 = arith.constant 0 : index
    %31 = vector.load %arg10[%c18, %c0_27] : memref<64x32xbf16, #tpu.memory_space<vmem>>, vector<40x32xbf16>
    %32 = tpu.concatenate %23, %24, %25, %26, %27, %28, %29, %30, %31 in 1 : vector<40x32xbf16>, vector<40x32xbf16>, vector<40x32xbf16>, vector<40x32xbf16>, vector<40x32xbf16>, vector<40x32xbf16>, vector<40x32xbf16>, vector<40x32xbf16>, vector<40x32xbf16> -> vector<40x288xbf16>
    %c0_28 = arith.constant 0 : index
    %c0_29 = arith.constant 0 : index
    %33 = vector.load %arg4[%c0_28, %c0_29] : memref<288x64xbf16, #tpu.memory_space<vmem>>, vector<288x64xbf16>
    %cst_30 = arith.constant dense<0.000000e+00> : vector<40x64xf32>
    %34 = tpu.matmul %32, %33, %cst_30 {dimension_numbers = #tpu.dot_dimension_numbers<[1], [0], [0], [1], [0, 0, 1, 1], [], []>} : vector<40x288xbf16>, vector<288x64xbf16>, vector<40x64xf32> -> vector<40x64xf32>
    %c0_31 = arith.constant 0 : index
    %c0_32 = arith.constant 0 : index
    %35 = vector.load %arg5[%c0_31, %c0_32] : memref<1x64xf32, #tpu.memory_space<vmem>>, vector<1x64xf32>
    %36 = vector.broadcast %35 : vector<1x64xf32> to vector<40x64xf32>
    %37 = arith.addf %34, %36 : vector<40x64xf32>
    %cst_33 = arith.constant 0.000000e+00 : f32
    %38 = vector.broadcast %cst_33 : f32 to vector<40x64xf32>
    %39 = arith.maximumf %37, %38 : vector<40x64xf32>
    %c0_34 = arith.constant 0 : index
    %c0_35 = arith.constant 0 : index
    %40 = vector.load %arg6[%c0_34, %c0_35] : memref<40x1xf32, #tpu.memory_space<vmem>>, vector<40x1xf32>
    %41 = vector.broadcast %40 : vector<40x1xf32> to vector<40x64xf32>
    %42 = arith.mulf %39, %41 : vector<40x64xf32>
    %cst_36 = arith.constant dense<0.000000e+00> : vector<64xf32>
    %43 = vector.multi_reduction <add>, %42, %cst_36 [0] : vector<40x64xf32> to vector<64xf32>
    %44 = vector.shape_cast %43 : vector<64xf32> to vector<1x64xf32>
    %c0_37 = arith.constant 0 : index
    %c0_38 = arith.constant 0 : index
    %45 = vector.load %arg7[%c0_37, %c0_38] : memref<1x64xf32, #tpu.memory_space<vmem>>, vector<1x64xf32>
    %46 = arith.mulf %44, %45 : vector<1x64xf32>
    %cst_39 = arith.constant dense<0.000000e+00> : vector<1xf32>
    %47 = vector.multi_reduction <add>, %46, %cst_39 [1] : vector<1x64xf32> to vector<1xf32>
    %48 = vector.shape_cast %47 : vector<1xf32> to vector<1x1xf32>
    %c0_40 = arith.constant 0 : index
    %c0_41 = arith.constant 0 : index
    %49 = vector.load %arg8[%c0_40, %c0_41] : memref<1x1xf32, #tpu.memory_space<vmem>>, vector<1x1xf32>
    %50 = arith.addf %48, %49 : vector<1x1xf32>
    %51 = arith.negf %50 : vector<1x1xf32>
    %52 = math.exp %51 : vector<1x1xf32>
    %cst_42 = arith.constant 1.000000e+00 : f32
    %53 = vector.broadcast %cst_42 : f32 to vector<1x1xf32>
    %54 = arith.addf %53, %52 : vector<1x1xf32>
    %55 = arith.divf %53, %54 : vector<1x1xf32>
    %56 = vector.shape_cast %55 : vector<1x1xf32> to vector<1x1x1xf32>
    %c0_43 = arith.constant 0 : index
    %c0_44 = arith.constant 0 : index
    %c0_45 = arith.constant 0 : index
    %57 = vector.load %arg9[%c0_43, %c0_44, %c0_45] : memref<1x1x1xf32, #tpu.memory_space<vmem>>, vector<1x1x1xf32>
    tpu.vector_store %arg9[%c0_43, %c0_44, %c0_45], %56 {strides = array<i32>} : memref<1x1x1xf32, #tpu.memory_space<vmem>>, vector<1x1x1xf32>,
    return
  }
  func.func @transform_0(%arg0: i32) -> (i32, i32, i32) {
    %c0_i32 = arith.constant 0 : i32
    %c0_i32_0 = arith.constant 0 : i32
    %c0_i32_1 = arith.constant 0 : i32
    return %arg0, %c0_i32, %c0_i32_0 : i32, i32, i32
  }
  func.func @transform_1(%arg0: i32) -> (i32, i32) {
    %c0_i32 = arith.constant 0 : i32
    %c0_i32_0 = arith.constant 0 : i32
    %c0_i32_1 = arith.constant 0 : i32
    return %c0_i32, %c0_i32_0 : i32, i32
  }
  func.func @transform_2(%arg0: i32) -> (i32, i32) {
    %c0_i32 = arith.constant 0 : i32
    %c0_i32_0 = arith.constant 0 : i32
    %c0_i32_1 = arith.constant 0 : i32
    return %c0_i32, %c0_i32_0 : i32, i32
  }
  func.func @transform_3(%arg0: i32) -> (i32, i32) {
    %c0_i32 = arith.constant 0 : i32
    %c0_i32_0 = arith.constant 0 : i32
    %c0_i32_1 = arith.constant 0 : i32
    return %c0_i32, %c0_i32_0 : i32, i32
  }
  func.func @transform_4(%arg0: i32) -> (i32, i32) {
    %c0_i32 = arith.constant 0 : i32
    %c0_i32_0 = arith.constant 0 : i32
    %c0_i32_1 = arith.constant 0 : i32
    return %c0_i32, %c0_i32_0 : i32, i32
  }
  func.func @transform_5(%arg0: i32) -> (i32, i32) {
    %c0_i32 = arith.constant 0 : i32
    %c0_i32_0 = arith.constant 0 : i32
    %c0_i32_1 = arith.constant 0 : i32
    return %c0_i32, %c0_i32_0 : i32, i32
  }
  func.func @transform_6(%arg0: i32) -> (i32, i32) {
    %c0_i32 = arith.constant 0 : i32
    %c0_i32_0 = arith.constant 0 : i32
    %c0_i32_1 = arith.constant 0 : i32
    return %c0_i32, %c0_i32_0 : i32, i32
  }
  func.func @transform_7(%arg0: i32) -> (i32, i32) {
    %c0_i32 = arith.constant 0 : i32
    %c0_i32_0 = arith.constant 0 : i32
    %c0_i32_1 = arith.constant 0 : i32
    return %c0_i32, %c0_i32_0 : i32, i32
  }
  func.func @transform_8(%arg0: i32) -> (i32, i32, i32) {
    %c0_i32 = arith.constant 0 : i32
    %c0_i32_0 = arith.constant 0 : i32
    %c0_i32_1 = arith.constant 0 : i32
    return %arg0, %c0_i32, %c0_i32_0 : i32, i32, i32
  }
}

</mosaic_0001>

<bundles_post_ra>
// kernel: video_classifier_forward.1
= control target key start
LH: loop header
LB: loop body
LE: loop exit
PB: predicated region body
PF: predicated region fallthrough
CT: control target
= control target key end

     0   :  { %s1477_s29 = smov 0   ;;  %s1788_s0 = inlined_call_operand.vmem [shape: bf16[2,80,12], index: 0, kind: input, shape index: {}]   ;;  %s1789_s1 = inlined_call_operand.vmem [shape: bf16[48,128], index: 1, kind: input, shape index: {}]   ;;  %s1790_s2 = inlined_call_operand.vmem [shape: f32[1,32], index: 2, kind: input, shape index: {}]   ;;  %s1791_s3 = inlined_call_operand.vmem [shape: bf16[288,64], index: 3, kind: input, shape index: {}]   ;;  %s1792_s4 = inlined_call_operand.vmem [shape: f32[1,64], index: 4, kind: input, shape index: {}]   ;;  %s1793_s5 = inlined_call_operand.vmem [shape: f32[40,1], index: 5, kind: input, shape index: {}]   ;;  %s1794_s6 = inlined_call_operand.vmem [shape: f32[1,64], index: 6, kind: input, shape index: {}]   ;;  %s1795_s7 = inlined_call_operand.<no memory space> [shape: f32[1,1], index: 7, kind: input, shape index: {}]   ;;  %s1796_s8 = inlined_call_operand.vmem [shape: f32[2,1,1], index: 8, kind: output, shape index: {}]  }
   0x1   :  { %v13_v0 = vstv %s1795_s7 }
   0x2   :  { %14 = vst [vmem:[#allocation3] sm:$0x1] %v13_v0 }
   0x3 LB: > { %s1232_s30 = sadd.s32 4294967295, %s1418_s29   ;;  %p1236_p0 = scmp.ge.s32.totalorder %s1418_s29, 1  ;;  %s1418_s29 = sphi %s1477_s29, %s20_s29  }
   0x4   : > { %p264_p1 = scmp.lt.s32.totalorder %s1418_s29, 3 }
   0x6   : > { %p265_p2 = pnand %p1236_p0, %p264_p1 }
   0x7   : > { %p296_p3 = scmp.lt.s32.totalorder (!%p265_p2), %s1232_s30, 1  ;;  %v1387_v1 = vld [vmem:[%s1789_s1] sm:$0xff] (!%p265_p2)   ;;  %v1388_v2 = vld [vmem:[%s1789_s1 + $0x8] sm:$0xff] (!%p265_p2)   ;;  %vm339_vm0 = vsmask.f32 (!%p265_p2), 7424  ;;  %s1420_s16 = smov (!%p265_p2), 24  }
   0x8   : > { %268 = sbr.rel (%p265_p2) target bundleno = 1185 (0x4a1), region = 52  ;;  %1327 = vmatprep.subr.bf16.mxu0 (!%p265_p2), %v1387_v1  ;;  %v1389_v25 = vld [vmem:[%s1789_s1 + $0x10] sm:$0xff] (!%p265_p2)   ;;  %s1421_s19 = smov (!%p265_p2), 12   ;;  %vm445_vm1 = vcmask (!%p265_p2), 97280   ;;  %vm454_vm2 = vcmask (!%p265_p2), 195584   ;;  %vm463_vm3 = vcmask (!%p265_p2), 293888  }
   0x9   : > { %1328 = vmatpush3.bf16.msra.mxu0 (!%p265_p2), %v1387_v1  ;;  %s1422_s20 = smov (!%p265_p2), 36   ;;  %vm496_vm4 = vcmask (!%p265_p2), 392192   ;;  %s1423_s21 = smov (!%p265_p2), 64   ;;  %vm1426_vm5 = vmmov (!%p265_p2), 0   ;;  %vm645_vm6 = vcmask (!%p265_p2), 261120   ;;  %vm749_vm7 = vcmask (!%p265_p2), 1042432  }
   0xa   : > { %1329 = vmatprep.subr.bf16.mxu0 (!%p265_p2), %v1388_v2  ;;  %s1424_s22 = smov (!%p265_p2), 32   ;;  %vm694_vm8 = vcmask (!%p265_p2), 1046528   ;;  %vm708_vm9 = vcmask (!%p265_p2), 1043456   ;;  %s1427_s23 = smov (!%p265_p2), 96   ;;  %vm720_vm10 = vsmask.f32 (!%p265_p2), 3328 }
   0xb   : > { %vm801_vm11 = vcmask (!%p265_p2), 523264   ;;  %vm808_vm12 = vcmask (!%p265_p2), 785408   ;;  %vm1171_vm13 = vcmask (!%p265_p2), 516096   ;;  %vm1183_vm14 = vcmask (!%p265_p2), 0  }
   0xd   : > { %1330 = vmatpush3.bf16.msra.mxu0 (!%p265_p2), %v1388_v2 }
   0xe   : > { %1331 = vmatprep.subr.bf16.mxu0 (!%p265_p2), %v1389_v25 }
   0xf   : > { %s1798_s30 = smov (!%p296_p3, %s1232_s30), 1 }
  0x10   : > { %s1357_s7 = smul.u32 40, %s1798_s30  ;;  %s303_s17 = scalar_lea.vmem %s1796_s8, %s1798_s30 }
  0x11   : > { %1332 = vmatpush3.bf16.msra.mxu0 %v1389_v25 }
  0x12   : > { %s1497_s15 = scalar_lea.vmem %s1788_s0, %s1357_s7 }
  0x13   : > { %v306_v3 = vld [vmem:[%s1497_s15 + $0x4] sm:$0xf]  ;;  %v307_v4 = vld [vmem:[%s1497_s15 + $0x8] sm:$0xf]  ;;  %v305_v5 = vld [vmem:[%s1497_s15] sm:$0xf] }
  0x14   : > { %v1243_v6 = vcombine.low %v306_v3, %v307_v4  ;;  %v1502_v7 = vcombine.low %v305_v5, %v306_v3  ;;  %v310_v8 = vld [vmem:[%s1497_s15 + $0x14] sm:$0xf]  ;;  %v311_v9 = vld [vmem:[%s1497_s15 + $0x18] sm:$0xf]  ;;  %v308_v10 = vld [vmem:[%s1497_s15 + $0xc] sm:$0xf] }
  0x15   : > { %v1507_v11 = vcombine.low %v310_v8, %v311_v9  ;;  %v309_v12 = vld [vmem:[%s1497_s15 + $0x10] sm:$0xf]  ;;  %v1510_v13 = vcombine.low %v307_v4, %v308_v10  ;;  %v312_v14 = vld [vmem:[%s1497_s15 + $0x1c] sm:$0xf]  ;;  %v314_v15 = vld [vmem:[%s1497_s15 + $0x20] sm:$0xf] }
  0x16   : > { %390 = vrot.lane.b32.xlu1 %v1243_v6, %s1420_s16  ;;  %v404_v16 = vshll.u32 %v1243_v6, 16  ;;  %v1515_v17 = vcombine.low %v309_v12, %v310_v8  ;;  %v1244_v18 = vcombine.low %v308_v10, %v309_v12  ;;  %v341_v19 = vshrl.u32 %v1502_v7, 16  ;;  %v1385_v24 = vld [vmem:[%s1497_s15 + $0x20] ss:$0 sps:$4 sm:$0x11]  }
  0x17   : > { %394 = vrot.lane.b32.xlu0 %v1507_v11, %s1420_s16  ;;  %v343_v20 = vshll.u32 %v1502_v7, 16  ;;  %v348_v21 = vshll.u32 %v1510_v13, 16  ;;  %v1522_v22 = vcombine.low %v311_v9, %v312_v14  ;;  %v1246_v23 = vcombine.low %v312_v14, %v314_v15  ;;  %v1386_v42 = vld [vmem:[%s1497_s15 + $0x24] ss:$0 sps:$4 sm:$0x11]  }
  0x18   : > { %v409_v26 = vshll.u32 %v1244_v18, 16  ;;  %v352_v27 = vshrl.u32 %v1510_v13, 16  ;;  %v356_v28 = vshll.u32 %v1515_v17, 16  ;;  %v413_v29 = vshrl.u32 %v1244_v18, 16 }
  0x19   : > { %v345_v30 = vrot.slane %v343_v20, 1  ;;  %v350_v31 = vrot.slane %v348_v21, 1  ;;  %v425_v32 = vshll.u32 %v1246_v23, 16  ;;  %v417_v33 = vshll.u32 %v1507_v11, 16 }
  0x1a   : > { %392 = vrot.lane.b32.xlu1 %v1244_v18, %s1420_s16  ;;  %v358_v34 = vrot.slane %v356_v28, 1  ;;  %v411_v35 = vrot.slane %v409_v26, 1  ;;  %v402_v36 = vshrl.u32 %v1243_v6, 16  ;;  %v406_v37 = vrot.slane %v404_v16, 1 }
  0x1b   : > { %v346_v38 = vor.u32 %v345_v30, %v341_v19  ;;  %v354_v39 = vor.u32 %v352_v27, %v350_v31  ;;  %v419_v40 = vrot.slane %v417_v33, 1  ;;  %v364_v41 = vshll.u32 %v1522_v22, 16 }
  0x1c   : > { %v415_v43 = vor.u32 %v413_v29, %v411_v35  ;;  %v368_v44 = vshrl.u32 %v1522_v22, 16  ;;  %v372_v45 = vshll.u32 %v1385_v24, 16  ;;  %v360_v48 = vshrl.u32 %v1515_v17, 16 }
  0x1d   : > { %v351_v46 = vsel %vm339_vm0, %v346_v38, %v350_v31  ;;  %v366_v47 = vrot.slane %v364_v41, 1  ;;  %v359_v49 = vsel %vm339_vm0, %v354_v39, %v358_v34  ;;  %v407_v50 = vor.u32 %v406_v37, %v402_v36 }
  0x1e   : > { %376 = vrot.lane.b32.xlu0 %v351_v46, %s1421_s19  ;;  %396 = vrot.lane.b32.xlu1 %v1246_v23, %s1420_s16  ;;  %v374_v51 = vrot.slane %v372_v45, 1  ;;  %v427_v52 = vrot.slane %v425_v32, 1  ;;  %v420_v53 = vsel %vm339_vm0, %v415_v43, %v419_v40  ;;  %v429_v55 = vshrl.u32 %v1246_v23, 16  ;;  %v1390_v46 = vld [vmem:[%s1791_s3 + $0x80] sm:$0xff]  }
  0x1f   : > { %v370_v54 = vor.u32 %v368_v44, %v366_v47  ;;  %v433_v56 = vshll.u32 %v1386_v42, 16  ;;  %v421_v58 = vshrl.u32 %v1507_v11, 16  ;;  %v412_v59 = vsel %vm339_vm0, %v407_v50, %v411_v35 }
  0x20   : > { %v362_v61 = vor.u32 %v360_v48, %v358_v34  ;;  %v431_v62 = vor.u32 %v429_v55, %v427_v52  ;;  %v1425_v48 = vmov 0.0   ;;  %v1393_v55 = vld [vmem:[%s1791_s3] sm:$0xff]  }
  0x21   : > { %v435_v57 = vrot.slane %v433_v56, 1  ;;  %v375_v60 = vsel %vm339_vm0, %v370_v54, %v374_v51  ;;  %v423_v1 = vor.u32 %v421_v58, %v419_v40  ;;  %1341 = vmatprep.subr.bf16.mxu0 %v1425_v48  ;;  %v1392_v54 = vld [vmem:[%s1791_s3 + $0x40] sm:$0xff]   ;;  %v1394_v56 = vld [vmem:[%s1791_s3 + $0x48] sm:$0xff]   ;;  %v1396_v58 = vld [vmem:[%s1791_s3 + $0x50] sm:$0xff]  }
  0x22   : > { %378 = vrot.lane.b32.xlu0 %v359_v49, %s1421_s19  ;;  %439 = vrot.lane.b32.xlu1 %v420_v53, %s1422_s20  ;;  %v367_v63 = vsel %vm339_vm0, %v362_v61, %v366_v47 }
  0x23   : > { %v436_v0 = vsel %vm339_vm0, %v431_v62, %v435_v57  ;;  %v428_v2 = vsel %vm339_vm0, %v423_v1, %v427_v52  ;;  %v1391_v52 = vld [vmem:[%s1791_s3 + $0x88] sm:$0xff]   ;;  %1288 = vmatprep.subr.bf16.mxu1 %v1392_v54 }
  0x24   : > { %1289 = vmatpush3.bf16.msra.mxu1 %v1393_v55  ;;  %v1395_v57 = vld [vmem:[%s1791_s3 + $0x8] sm:$0xff]  }
  0x25   : > { %1290 = vmatprep.subr.bf16.mxu1 %v1394_v56 }
  0x26   : > { %437 = vrot.lane.b32.xlu0 %v412_v59, %s1422_s20  ;;  %382 = vrot.lane.b32.xlu1 %v375_v60, %s1421_s19  ;;  %v1397_v59 = vld [vmem:[%s1791_s3 + $0x10] sm:$0xff]   ;;  %v1255_v60 = vld [vmem:[%s1790_s2] ss:$0 sm:$0xff] }
  0x28   : > { %1291 = vmatpush3.bf16.msra.mxu1 %v1395_v57 }
  0x29   : > { %1292 = vmatprep.subr.bf16.mxu1 %v1396_v58 }
  0x2a   : > { %380 = vrot.lane.b32.xlu0 %v367_v63, %s1421_s19  ;;  %443 = vrot.lane.b32.xlu1 %v436_v0, %s1422_s20 }
  0x2c   : > { %1293 = vmatpush3.bf16.msra.mxu1 %v1397_v59 }
  0x2e   : > { %441 = vrot.lane.b32.xlu0 %v428_v2, %s1422_s20 }
  0x88   : > { %v391_v3 = vpop.permute.xlu1 %390 }
  0x89   : > { %v395_v4 = vpop.permute.xlu0 %394 }
  0x8c   : > { %v393_v5 = vpop.permute.xlu1 %392 }
  0x90   : > { %v377_v6 = vpop.permute.xlu0 %376  ;;  %v397_v8 = vpop.permute.xlu1 %396 }
  0x91   : > { %v447_v11 = vsel %vm445_vm1, %v1502_v7, %v377_v6  ;;  %v1399_v6 = vld [vmem:[%s1791_s3 + $0x18] sm:$0xff]  }
  0x92   : > { %v456_v16 = vsel %vm454_vm2, %v447_v11, %v391_v3 }
  0x94   : > { %v379_v9 = vpop.permute.xlu0 %378  ;;  %v440_v10 = vpop.permute.xlu1 %439 }
  0x95   : > { %v449_v12 = vsel %vm445_vm1, %v1510_v13, %v379_v9 }
  0x96   : > { %v458_v14 = vsel %vm454_vm2, %v449_v12, %v393_v5  ;;  %v1398_v5 = vld [vmem:[%s1791_s3 + $0x58] sm:$0xff]  }
  0x97   : > { %v467_v20 = vsel %vm463_vm3, %v458_v14, %v440_v10  ;;  %1294 = vmatprep.subr.bf16.mxu1 %v1398_v5 }
  0x98   : > { %v438_v15 = vpop.permute.xlu0 %437  ;;  %v383_v18 = vpop.permute.xlu1 %382  ;;  %1295 = vmatpush3.bf16.msra.mxu1 %v1399_v6 }
  0x99   : > { %v465_v19 = vsel %vm463_vm3, %v456_v16, %v438_v15  ;;  %v453_v21 = vsel %vm445_vm1, %v1522_v22, %v383_v18  ;;  %v1401_v15 = vld [vmem:[%s1791_s3 + $0x20] sm:$0xff]  }
  0x9a   : > { %1333 = vmatprep.mubr.msk.bf16.mxu0 %vm496_vm4, %v465_v19  ;;  %v462_v26 = vsel %vm454_vm2, %v453_v21, %v397_v8  ;;  %v1400_v8 = vld [vmem:[%s1791_s3 + $0x60] sm:$0xff]  }
  0x9b   : > { %1334 = vmatmul.mubr.msk.bf16.vlgmr.msra.gmra.mrb[0].mxu0 %vm496_vm4, %v467_v20  ;;  %1296 = vmatprep.subr.bf16.mxu1 %v1400_v8 }
  0x9c   : > { %v381_v7 = vpop.permute.xlu0 %380  ;;  %v444_v23 = vpop.permute.xlu1 %443  ;;  %1342 = vmatpush3.bf16.msra.mxu0 %v1390_v46  ;;  %1297 = vmatpush3.bf16.msra.mxu1 %v1401_v15 }
  0x9d   : > { %v451_v13 = vsel %vm445_vm1, %v1515_v17, %v381_v7  ;;  %v471_v28 = vsel %vm463_vm3, %v462_v26, %v444_v23  ;;  %1343 = vmatprep.subr.bf16.mxu0 %v1425_v48 }
  0x9e   : > { %v460_v24 = vsel %vm454_vm2, %v451_v13, %v395_v4 }
  0xa0   : > { %v442_v25 = vpop.permute.xlu0 %441  ;;  %1344 = vmatpush3.bf16.msra.mxu0 %v1391_v52 }
  0xa1   : > { %v469_v27 = vsel %vm463_vm3, %v460_v24, %v442_v25 }
  0xa2   : > { %1337 = vmatprep.mubr.msk.bf16.mxu0 %vm496_vm4, %v469_v27  ;;  %v1402_v27 = vld [vmem:[%s1791_s3 + $0x68] sm:$0xff]  }
  0xa3   : > { %1338 = vmatmul.mubr.msk.bf16.gmra.mrb[4].mxu0 %vm496_vm4, %v471_v28  ;;  %v1403_v28 = vld [vmem:[%s1791_s3 + $0x28] sm:$0xff]   ;;  %1298 = vmatprep.subr.bf16.mxu1 %v1402_v27 }
  0xa4   : > { %1345 = vmatprep.mubr.msk.bf16.mxu0 %vm1426_vm5, %v1425_v48  ;;  %1299 = vmatpush3.bf16.msra.mxu1 %v1403_v28 }
 0x16e   : > { %v1335_v29 = vpop.f32.mrb[0].mxu0 }
 0x16f   : > { %574 = vrot.lane.b32.xlu0 %v1335_v29, %s1423_s21  ;;  %v539_v17 = vpop.f32.mrb[1].mxu0 }
 0x170   : > { %v1336_v22 = vpop.f32.mrb[2].mxu0 }
 0x171   : > { %576 = vrot.lane.b32.xlu1 %v1336_v22, %s1423_s21  ;;  %v542_v30 = vpop.f32.mrb[3].mxu0 }
 0x173   : > { %570 = vrot.lane.b32.xlu0 %v539_v17, %s1423_s21 }
 0x175   : > { %572 = vrot.lane.b32.xlu1 %v542_v30, %s1423_s21 }
 0x176   : > { %v1339_v31 = vpop.f32.mrb[4].mxu0 }
 0x177   : > { %v555_v32 = vpop.f32.mrb[5].mxu0 }
 0x178   : > { %578 = vrot.lane.b32.xlu0 %v555_v32, %s1423_s21  ;;  %v1340_v33 = vpop.f32.mrb[6].mxu0 }
 0x179   : > { %v558_v34 = vpop.f32.mrb[7].mxu0 }
 0x17a   : > { %580 = vrot.lane.b32.xlu1 %v558_v34, %s1423_s21 }
 0x17c   : > { %582 = vrot.lane.b32.xlu0 %v1339_v31, %s1423_s21 }
 0x17e   : > { %584 = vrot.lane.b32.xlu1 %v1340_v33, %s1423_s21 }
 0x1e1   : > { %v575_v35 = vpop.permute.xlu0 %574 }
 0x1e2   : > { %v588_v36 = vmax.f32 %v1335_v29, %v575_v35  ;;  %v1405_v35 = vld [vmem:[%s1791_s3 + $0x30] sm:$0xff]  }
 0x1e3   : > { %v577_v37 = vpop.permute.xlu1 %576 }
 0x1e4   : > { %v589_v38 = vmax.f32 %v1336_v22, %v577_v37  ;;  %598 = vrot.lane.b32.xlu0 %v588_v36, %s1424_s22 }
 0x1e5   : > { %v571_v39 = vpop.permute.xlu0 %570 }
 0x1e6   : > { %v586_v40 = vmax.f32 %v539_v17, %v571_v39  ;;  %600 = vrot.lane.b32.xlu1 %v589_v38, %s1424_s22 }
 0x1e7   : > { %v573_v41 = vpop.permute.xlu1 %572 }
 0x1e8   : > { %v587_v42 = vmax.f32 %v542_v30, %v573_v41  ;;  %594 = vrot.lane.b32.xlu0 %v586_v40, %s1424_s22  ;;  %v1406_v41 = vld [vmem:[%s1791_s3 + $0x78] sm:$0xff]  }
 0x1ea   : > { %596 = vrot.lane.b32.xlu1 %v587_v42, %s1424_s22  ;;  %v579_v43 = vpop.permute.xlu0 %578 }
 0x1eb   : > { %v1578_v44 = vmax.f32 %v555_v32, %v579_v43 }
 0x1ec   : > { %v581_v45 = vpop.permute.xlu1 %580 }
 0x1ed   : > { %v1583_v47 = vmax.f32 %v558_v34, %v581_v45  ;;  %602 = vrot.lane.b32.xlu0 %v1578_v44, %s1424_s22  ;;  %v1404_v34 = vld [vmem:[%s1791_s3 + $0x70] sm:$0xff]  }
 0x1ee   : > { %v583_v49 = vpop.permute.xlu0 %582  ;;  %1300 = vmatprep.subr.bf16.mxu1 %v1404_v34 }
 0x1ef   : > { %v1588_v50 = vmax.f32 %v1339_v31, %v583_v49  ;;  %604 = vrot.lane.b32.xlu1 %v1583_v47, %s1424_s22  ;;  %1301 = vmatpush3.bf16.msra.mxu1 %v1405_v35 }
 0x1f0   : > { %v585_v51 = vpop.permute.xlu1 %584  ;;  %1302 = vmatprep.subr.bf16.mxu1 %v1406_v41 }
 0x1f1   : > { %v1596_v53 = vmax.f32 %v1340_v33, %v585_v51  ;;  %606 = vrot.lane.b32.xlu0 %v1588_v50, %s1424_s22 }
 0x1f3   : > { %608 = vrot.lane.b32.xlu1 %v1596_v53, %s1424_s22 }
 0x256   : > { %v599_v61 = vpop.permute.xlu0 %598 }
 0x257   : > { %v612_v62 = vmax.f32 %v588_v36, %v599_v61 }
 0x258   : > { %v601_v63 = vpop.permute.xlu1 %600 }
 0x259   : > { %v627_v0 = vadd.f32 %v1255_v60, %v612_v62  ;;  %v613_v1 = vmax.f32 %v589_v38, %v601_v63 }
 0x25a   : > { %v595_v2 = vpop.permute.xlu0 %594 }
 0x25b   : > { %v628_v3 = vadd.f32 %v1255_v60, %v613_v1  ;;  %v610_v4 = vmax.f32 %v586_v40, %v595_v2  ;;  %v635_v10 = vmax.f32 %v627_v0, 0.0 }
 0x25c   : > { %v597_v9 = vpop.permute.xlu1 %596 }
 0x25d   : > { %v636_v11 = vmax.f32 %v628_v3, 0.0  ;;  %v625_v12 = vadd.f32 %v1255_v60, %v610_v4  ;;  %v611_v14 = vmax.f32 %v587_v42, %v597_v9  ;;  %v1407_v42 = vld [vmem:[%s1791_s3 + $0x38] sm:$0xff]  }
 0x25e   : > { %1303 = vmatpush3.bf16.msra.mxu1 %v1407_v42 }
 0x25f   : > { %v642_v16 = vpack.c.bf16 %v636_v11, %v635_v10  ;;  %v626_v18 = vadd.f32 %v1255_v60, %v611_v14  ;;  %v603_v19 = vpop.permute.xlu0 %602  ;;  %v633_v7 = vmax.f32 %v625_v12, 0.0 }
 0x260   : > { %v614_v20 = vmax.f32 %v1578_v44, %v603_v19 }
 0x261   : > { %647 = vst.msk [vmem:[#allocation2 + $0x8] sm:$0xff] %vm645_vm6, %v642_v16  ;;  %v634_v13 = vmax.f32 %v626_v18, 0.0  ;;  %v605_v21 = vpop.permute.xlu1 %604 }
 0x262   : > { %v629_v23 = vadd.f32 %v1255_v60, %v614_v20  ;;  %v615_v24 = vmax.f32 %v1583_v47, %v605_v21 }
 0x263   : > { %v641_v25 = vpack.c.bf16 %v634_v13, %v633_v7  ;;  %v607_v26 = vpop.permute.xlu0 %606 }
 0x264   : > { %v630_v29 = vadd.f32 %v1255_v60, %v615_v24  ;;  %v616_v17 = vmax.f32 %v1588_v50, %v607_v26  ;;  %v637_v30 = vmax.f32 %v629_v23, 0.0 }
 0x265   : > { %646 = vst.msk [vmem:[#allocation2] sm:$0xff] %vm645_vm6, %v641_v25  ;;  %v609_v22 = vpop.permute.xlu1 %608 }
 0x266   : > { %v638_v31 = vmax.f32 %v630_v29, 0.0  ;;  %v631_v32 = vadd.f32 %v1255_v60, %v616_v17  ;;  %v617_v33 = vmax.f32 %v1596_v53, %v609_v22 }
 0x268   : > { %v643_v36 = vpack.c.bf16 %v638_v31, %v637_v30  ;;  %v632_v37 = vadd.f32 %v1255_v60, %v617_v33  ;;  %v1655_v38 = vld [vmem:[#allocation2 + $0x8] sm:$0xff]  ;;  %v639_v39 = vmax.f32 %v631_v32, 0.0 }
 0x269   : > { %764 = vrot.lane.b32.xlu0 %v1655_v38, %s1423_s21  ;;  %v751_v49 = vrot.slane %v1655_v38, 5  ;;  %v696_v51 = vrot.slane %v1655_v38, 1  ;;  %v670_v54 = vshll.u32 %v1655_v38, 16  ;;  %v661_v58 = vld [vmem:[#allocation2 + $0x8] sm:$0xfe]  ;;  %v674_v61 = vshrl.u32 %v1655_v38, 16 }
 0x26a   : > { %648 = vst.msk [vmem:[#allocation2 + $0x10] sm:$0xff] %vm645_vm6, %v643_v36  ;;  %v640_v40 = vmax.f32 %v632_v37, 0.0  ;;  %v710_v62 = vrot.slane %v1655_v38, 4  ;;  %v789_v2 = vrot.slane %v661_v58, 1  ;;  %v1121_v58 = vld [vmem:[%s1793_s5 + $0x10] sm:$0xff] }
 0x26b   : > { %v672_v4 = vrot.slane %v670_v54, 1  ;;  %v730_v14 = vrot.slane %v670_v54, 5  ;;  %v729_v15 = vrot.slane %v674_v61, 4 }
 0x26c   : > { %v644_v43 = vpack.c.bf16 %v640_v40, %v639_v39  ;;  %v658_v44 = vld [vmem:[#allocation2] sm:$0xe0] }
 0x26d   : > { %v654_v45 = vld [vmem:[#allocation2] sm:$0xfe]  ;;  %v750_v47 = vrot.slane %v658_v44, 5  ;;  %v676_v27 = vor.u32 %v674_v61, %v672_v4  ;;  %v731_v22 = vor.u32 %v730_v14, %v729_v15 }
 0x26e   : > { %v655_v46 = vld [vmem:[#allocation2] sm:$0xf0]  ;;  %v695_v50 = vrot.slane %v654_v45, 1  ;;  %649 = vst.msk [vmem:[#allocation2 + $0x18] sm:$0xff] %vm645_vm6, %v644_v43 }
 0x26f   : > { %v1668_v52 = vld [vmem:[#allocation2] sm:$0xff]  ;;  %v752_v55 = vsel %vm749_vm7, %v750_v47, %v751_v49  ;;  %v709_v57 = vrot.slane %v655_v46, 4  ;;  %v722_v59 = vshrl.u32 %v655_v46, 16  ;;  %v725_v63 = vshll.u32 %v655_v46, 16 }
 0x270   : > { %v665_v53 = vshll.u32 %v1668_v52, 16  ;;  %v697_v56 = vsel %vm694_vm8, %v695_v50, %v696_v51  ;;  %757 = vrot.lane.b32.xlu0 %v752_v55, %s1424_s22  ;;  %v663_v1 = vshrl.u32 %v1668_v52, 16  ;;  %v1119_v55 = vld [vmem:[%s1793_s5] sm:$0xff] }
 0x271   : > { %700 = vrot.lane.b32.xlu1 %v697_v56, %s1423_s21  ;;  %v1679_v0 = vld [vmem:[#allocation2 + $0x10] sm:$0xff]  ;;  %v711_v6 = vsel %vm708_vm9, %v709_v57, %v710_v62  ;;  %v724_v16 = vrot.slane %v722_v59, 4  ;;  %v727_v7 = vrot.slane %v725_v63, 5  ;;  %v1120_v56 = vld [vmem:[%s1793_s5 + $0x8] sm:$0xff]  ;;  %v1428_v57 = vmov 0   ;;  %v1123_v59 = vld [vmem:[%s1793_s5 + $0x20] sm:$0xff] }
 0x272   : > { %v667_v60 = vrot.slane %v665_v53, 1  ;;  %v790_v3 = vrot.slane %v1679_v0, 1  ;;  %v737_v5 = vshll.u32 %v1679_v0, 16  ;;  %v753_v9 = vrot.slane %v1679_v0, 5  ;;  %v1686_v10 = vld [vmem:[#allocation2 + $0x10] sm:$0x1f]  ;;  %1375 = vset.pattern.permute.xlu0 %v1428_v57  ;;  %1376 = vset.pattern.permute.xlu1 %v1428_v57 }
 0x273   : > { %v734_v11 = vshrl.u32 %v1679_v0, 16  ;;  %v698_v21 = vrot.slane %v1686_v10, 1  ;;  %v712_v29 = vrot.slane %v1679_v0, 4  ;;  %v728_v17 = vor.u32 %v727_v7, %v724_v16 }
 0x274   : > { %v668_v8 = vor.u32 %v667_v60, %v663_v1  ;;  %766 = vrot.lane.b32.xlu0 %v1679_v0, %s1423_s21  ;;  %v791_v12 = vsel %vm694_vm8, %v789_v2, %v790_v3  ;;  %v739_v18 = vrot.slane %v737_v5, 5  ;;  %v770_v13 = vrot.slane %v737_v5, 1  ;;  %v1122_v60 = vld [vmem:[%s1793_s5 + $0x18] sm:$0xff] }
 0x275   : > { %714 = vrot.lane.b32.xlu1 %v711_v6, %s1427_s23  ;;  %1346 = vmatmul.mubr.msk.bf16.vlgmr.msra.gmra.mrb[8].mxu0 %vm645_vm6, %v791_v12  ;;  %v660_v19 = vld [vmem:[#allocation2 + $0x18] sm:$0x1f]  ;;  %v754_v25 = vsel %vm749_vm7, %v751_v49, %v753_v9  ;;  %v736_v26 = vrot.slane %v734_v11, 4  ;;  %v699_v32 = vsel %vm694_vm8, %v696_v51, %v698_v21  ;;  %v678_v33 = vshll.u32 %v1686_v10, 16 }
 0x276   : > { %v657_v20 = vld [vmem:[#allocation2 + $0x18] sm:$0x1]  ;;  %1349 = vmatprep.mubr.msk.bf16.mxu0 %vm1426_vm5, %v1425_v48  ;;  %v673_v24 = vsel %vm339_vm0, %v668_v8, %v672_v4  ;;  %v792_v28 = vrot.slane %v660_v19, 1  ;;  %v771_v31 = vsel %vm339_vm0, %v676_v27, %v770_v13  ;;  %v774_v36 = vshll.u32 %v660_v19, 16 }
 0x277   : > { %v743_v23 = vshll.u32 %v657_v20, 16  ;;  %v740_v30 = vor.u32 %v739_v18, %v736_v26  ;;  %v755_v35 = vrot.slane %v657_v20, 5  ;;  %v732_v37 = vsel %vm720_vm10, %v728_v17, %v731_v22  ;;  %v659_v51 = vld [vmem:[#allocation2 + $0x18] sm:$0xf] }
 0x278   : > { %759 = vrot.lane.b32.xlu0 %v754_v25, %s1424_s22  ;;  %v793_v40 = vsel %vm694_vm8, %v790_v3, %v792_v28  ;;  %v713_v42 = vsel %vm708_vm9, %v710_v62, %v712_v29  ;;  %v680_v44 = vrot.slane %v678_v33, 1  ;;  %v776_v45 = vrot.slane %v774_v36, 1 }
 0x279   : > { %685 = vrot.lane.b32.xlu1 %v673_v24, %s1424_s22  ;;  %v745_v34 = vrot.slane %v743_v23, 5  ;;  %v1707_v39 = vsel %vm720_vm10, %v731_v22, %v740_v30  ;;  %v756_v43 = vsel %vm749_vm7, %v753_v9, %v755_v35  ;;  %v772_v46 = vor.u32 %v770_v13, %v734_v11 }
 0x27a   : > { %v681_v47 = vsel %vm339_vm0, %v676_v27, %v680_v44  ;;  %v778_v53 = vshrl.u32 %v660_v19, 16 }
 0x27b   : > { %v1713_v41 = vsel %vm720_vm10, %v740_v30, %v745_v34  ;;  %v777_v49 = vsel %vm339_vm0, %v772_v46, %v776_v45  ;;  %v1256_v46 = vld [vmem:[%s1792_s4] ss:$0 sm:$0xff] }
 0x27c   : > { %781 = vrot.lane.b32.xlu0 %v771_v31, %s1427_s23  ;;  %v780_v54 = vor.u32 %v778_v53, %v776_v45 }
 0x27d   : > { %702 = vrot.lane.b32.xlu1 %v699_v32, %s1423_s21  ;;  %1350 = vmatmul.mubr.msk.bf16.gmra.mrb[12].mxu0 %vm645_vm6, %v793_v40 }
 0x27e   : > { %1353 = vmatprep.mubr.msk.bf16.mxu0 %vm1426_vm5, %v1425_v48  ;;  %v682_v48 = vshrl.u32 %v1686_v10, 16 }
 0x280   : > { %761 = vrot.lane.b32.xlu0 %v756_v43, %s1424_s22  ;;  %v684_v50 = vor.u32 %v682_v48, %v680_v44 }
 0x281   : > { %716 = vrot.lane.b32.xlu1 %v713_v42, %s1427_s23 }
 0x284   : > { %783 = vrot.lane.b32.xlu0 %v777_v49, %s1427_s23 }
 0x285   : > { %687 = vrot.lane.b32.xlu1 %v681_v47, %s1424_s22  ;;  %1354 = vmatmul.mubr.msk.bf16.gmra.mrb[16].mxu0 %vm645_vm6, %v792_v28 }
 0x288   : > { %768 = vrot.lane.b32.xlu0 %v659_v51, %s1423_s21 }
 0x289   : > { %689 = vrot.lane.b32.xlu1 %v684_v50, %s1424_s22 }
 0x28c   : > { %785 = vrot.lane.b32.xlu0 %v780_v54, %s1427_s23 }
 0x28d   : > { %704 = vrot.lane.b32.xlu1 %v698_v21, %s1423_s21 }
 0x290   : > { %1126 = vperm.xlu0 %1375, %v1119_v55  }
 0x291   : > { %718 = vrot.lane.b32.xlu1 %v712_v29, %s1427_s23 }
 0x294   : > { %1141 = vperm.xlu0 %1375, %v1122_v60  }
 0x295   : > { %1131 = vperm.xlu1 %1376, %v1120_v56  }
 0x299   : > { %1136 = vperm.xlu1 %1376, %v1121_v58  }
 0x29d   : > { %1146 = vperm.xlu1 %1376, %v1123_v59  }
 0x2db   : > { %v765_v61 = vpop.permute.xlu0 %764 }
 0x2e2   : > { %v758_v63 = vpop.permute.xlu0 %757 }
 0x2e3   : > { %v701_v62 = vpop.permute.xlu1 %700  ;;  %v820_v4 = vsel %vm645_vm6, %v732_v37, %v758_v63 }
 0x2e4   : > { %v828_v10 = vsel %vm801_vm11, %v820_v4, %v765_v61 }
 0x2e6   : > { %v767_v1 = vpop.permute.xlu0 %766 }
 0x2e7   : > { %v715_v0 = vpop.permute.xlu1 %714 }
 0x2ea   : > { %v760_v3 = vpop.permute.xlu0 %759 }
 0x2eb   : > { %v686_v2 = vpop.permute.xlu1 %685  ;;  %v823_v16 = vsel %vm645_vm6, %v1707_v39, %v760_v3 }
 0x2ec   : > { %v795_v5 = vsel %vm645_vm6, %v1668_v52, %v686_v2  ;;  %v830_v19 = vsel %vm801_vm11, %v823_v16, %v767_v1 }
 0x2ed   : > { %v803_v6 = vsel %vm801_vm11, %v795_v5, %v701_v62 }
 0x2ee   : > { %v782_v9 = vpop.permute.xlu0 %781  ;;  %v810_v12 = vsel %vm808_vm12, %v803_v6, %v715_v0 }
 0x2ef   : > { %v703_v8 = vpop.permute.xlu1 %702  ;;  %v834_v11 = vsel %vm808_vm12, %v828_v10, %v782_v9 }
 0x2f0   : > { %1034 = vmatprep.mubr.bf16.mxu1 %v834_v11 }
 0x2f1   : > { %1035 = vmatmul.mubr.bf16.vlgmr.msra.gmra.mrb[0].mxu1 %v810_v12 }
 0x2f2   : > { %v762_v15 = vpop.permute.xlu0 %761 }
 0x2f3   : > { %v717_v14 = vpop.permute.xlu1 %716  ;;  %v826_v25 = vsel %vm645_vm6, %v1713_v41, %v762_v15 }
 0x2f6   : > { %v784_v18 = vpop.permute.xlu0 %783 }
 0x2f7   : > { %v688_v52 = vpop.permute.xlu1 %687  ;;  %v837_v7 = vsel %vm808_vm12, %v830_v19, %v784_v18 }
 0x2f8   : > { %v797_v20 = vsel %vm645_vm6, %v1655_v38, %v688_v52  ;;  %1042 = vmatprep.mubr.bf16.mxu1 %v837_v7  ;;  %v652_v38 = vld [vmem:[#allocation2 + $0x10] sm:$0xf] }
 0x2f9   : > { %v805_v13 = vsel %vm801_vm11, %v797_v20, %v703_v8 }
 0x2fa   : > { %v813_v21 = vsel %vm808_vm12, %v805_v13, %v717_v14  ;;  %v769_v24 = vpop.permute.xlu0 %768 }
 0x2fb   : > { %v690_v23 = vpop.permute.xlu1 %689  ;;  %1043 = vmatmul.mubr.bf16.gmra.mrb[4].mxu1 %v813_v21  ;;  %v832_v26 = vsel %vm801_vm11, %v826_v25, %v769_v24 }
 0x2fc   : > { %v800_v17 = vsel %vm645_vm6, %v652_v38, %v690_v23 }
 0x2fe   : > { %v786_v28 = vpop.permute.xlu0 %785 }
 0x2ff   : > { %v705_v27 = vpop.permute.xlu1 %704  ;;  %v840_v29 = vsel %vm808_vm12, %v832_v26, %v786_v28 }
 0x300   : > { %1050 = vmatprep.mubr.bf16.mxu1 %v840_v29  ;;  %v807_v22 = vsel %vm801_vm11, %v800_v17, %v705_v27 }
 0x303   : > { %v719_v30 = vpop.permute.xlu1 %718 }
 0x304   : > { %v816_v31 = vsel %vm808_vm12, %v807_v22, %v719_v30 }
 0x305   : > { %1051 = vmatmul.mubr.bf16.gmra.mrb[8].mxu1 %v816_v31 }
 0x30f   : > { %v1127_v56 = vpop.permute.xlu0 %1126 }
 0x313   : > { %v1142_v16 = vpop.permute.xlu0 %1141 }
 0x314   : > { %v1132_v60 = vpop.permute.xlu1 %1131 }
 0x318   : > { %v1137_v15 = vpop.permute.xlu1 %1136 }
 0x31c   : > { %v1147_v17 = vpop.permute.xlu1 %1146 }
 0x348   : > { %v1092_v32 = vpop.f32.mrb[8].mxu0 }
 0x349   : > { %v1347_v33 = vpop.f32.mrb[9].mxu0 }
 0x34a   : > { %v1095_v34 = vpop.f32.mrb[10].mxu0 }
 0x34b   : > { %v1348_v35 = vpop.f32.mrb[11].mxu0 }
 0x350   : > { %v1100_v36 = vpop.f32.mrb[12].mxu0 }
 0x351   : > { %v1351_v37 = vpop.f32.mrb[13].mxu0 }
 0x352   : > { %v1103_v39 = vpop.f32.mrb[14].mxu0  ;;  %v1169_v37 = vld [vmem:[%s1794_s6] sm:$0x1] }
 0x353   : > { %v1352_v40 = vpop.f32.mrb[15].mxu0 }
 0x358   : > { %v1108_v41 = vpop.f32.mrb[16].mxu0 }
 0x359   : > { %v1355_v42 = vpop.f32.mrb[17].mxu0 }
 0x35a   : > { %v1111_v43 = vpop.f32.mrb[18].mxu0  ;;  %v1175_v42 = vld [vmem:[#allocation3] sm:$0x1] }
 0x35b   : > { %v1356_v44 = vpop.f32.mrb[19].mxu0 }
 0x3c4   : > { %v1304_v45 = vpop.f32.mrb[0].mxu1 }
 0x3c5   : > { %v1305_v47 = vpop.f32.mrb[1].mxu1 }
 0x3c6   : > { %v1306_v49 = vadd.f32 %v1305_v47, %v1304_v45  ;;  %v1307_v48 = vpop.f32.mrb[2].mxu1 }
 0x3c7   : > { %v1308_v50 = vpop.f32.mrb[3].mxu1 }
 0x3c8   : > { %v1037_v51 = vadd.f32 %v1306_v49, %v1256_v46  ;;  %v1309_v53 = vadd.f32 %v1308_v50, %v1307_v48 }
 0x3ca   : > { %v1040_v54 = vadd.f32 %v1309_v53, %v1256_v46  ;;  %v1093_v55 = vadd.f32 %v1092_v32, %v1037_v51 }
 0x3cc   : > { %v1114_v57 = vmax.f32 %v1093_v55, 0.0  ;;  %v1096_v58 = vadd.f32 %v1095_v34, %v1040_v54 }
 0x3ce   : > { %v1310_v59 = vpop.f32.mrb[4].mxu1  ;;  %v1149_v61 = vmul.f32 %v1127_v56, %v1114_v57  ;;  %v1115_v63 = vmax.f32 %v1096_v58, 0.0 }
 0x3cf   : > { %v1311_v62 = vpop.f32.mrb[5].mxu1 }
 0x3d0   : > { %v1312_v0 = vadd.f32 %v1311_v62, %v1310_v59  ;;  %v1313_v1 = vpop.f32.mrb[6].mxu1  ;;  %v1150_v2 = vmul.f32 %v1132_v60, %v1115_v63  ;;  %v1154_v6 = vsel %vm801_vm11, %v1149_v61, 0.0 }
 0x3d1   : > { %v1314_v3 = vpop.f32.mrb[7].mxu1 }
 0x3d2   : > { %v1045_v4 = vadd.f32 %v1312_v0, %v1256_v46  ;;  %v1315_v5 = vadd.f32 %v1314_v3, %v1313_v1  ;;  %v1155_v8 = vsel %vm801_vm11, %v1150_v2, 0.0 }
 0x3d3   : > { %v1156_v9 = vadd.f32 %v1155_v8, %v1154_v6 }
 0x3d4   : > { %v1048_v10 = vadd.f32 %v1315_v5, %v1256_v46  ;;  %v1101_v11 = vadd.f32 %v1100_v36, %v1045_v4 }
 0x3d6   : > { %v1116_v12 = vmax.f32 %v1101_v11, 0.0  ;;  %v1104_v14 = vadd.f32 %v1103_v39, %v1048_v10 }
 0x3d8   : > { %v1151_v52 = vmul.f32 %v1137_v15, %v1116_v12  ;;  %v1316_v18 = vpop.f32.mrb[8].mxu1  ;;  %v1117_v19 = vmax.f32 %v1104_v14, 0.0 }
 0x3d9   : > { %v1317_v20 = vpop.f32.mrb[9].mxu1 }
 0x3da   : > { %v1157_v7 = vsel %vm801_vm11, %v1151_v52, 0.0  ;;  %v1318_v13 = vadd.f32 %v1317_v20, %v1316_v18  ;;  %v1152_v21 = vmul.f32 %v1142_v16, %v1117_v19  ;;  %v1319_v23 = vpop.f32.mrb[10].mxu1 }
 0x3db   : > { %v1158_v24 = vadd.f32 %v1157_v7, %v1156_v9  ;;  %v1320_v25 = vpop.f32.mrb[11].mxu1 }
 0x3dc   : > { %v1053_v26 = vadd.f32 %v1318_v13, %v1256_v46  ;;  %v1159_v27 = vsel %vm801_vm11, %v1152_v21, 0.0 }
 0x3dd   : > { %v1160_v28 = vadd.f32 %v1159_v27, %v1158_v24 }
 0x3de   : > { %v1109_v29 = vadd.f32 %v1108_v41, %v1053_v26 }
 0x3e0   : > { %v1118_v38 = vmax.f32 %v1109_v29, 0.0 }
 0x3e2   : > { %v1153_v22 = vmul.f32 %v1147_v17, %v1118_v38 }
 0x3e4   : > { %v1161_v30 = vsel %vm801_vm11, %v1153_v22, 0.0 }
 0x3e5   : > { %v1162_v31 = vadd.f32 %v1161_v30, %v1160_v28 }
 0x3e7   : > { %v1163_v32 = vrot.slane %v1162_v31, 4 }
 0x3e9   : > { %v1164_v33 = vadd.f32 %v1163_v32, %v1162_v31 }
 0x3eb   : > { %v1165_v34 = vrot.slane %v1164_v33, 2 }
 0x3ed   : > { %v1166_v35 = vadd.f32 %v1165_v34, %v1164_v33 }
 0x3ef   : > { %v1167_v36 = vrot.slane %v1166_v35, 1 }
 0x3f1   : > { %v1168_v39 = vadd.f32 %v1167_v36, %v1166_v35 }
 0x3f3   : > { %v1170_v40 = vmul.f32 %v1169_v37, %v1168_v39 }
 0x3f5   : > { %v1172_v41 = vsel %vm1171_vm13, %v1170_v40, 0.0 }
 0x3f6   : > { %1173 = vadd.xlane.f32.xlu0 %v1172_v41 }
 0x483   : > { %v1174_v43 = vpop.xlane.xlu0 %1173 }
 0x484   : > { %v1176_v44 = vadd.f32 %v1175_v42, %v1174_v43 }
 0x486   : > { %v1278_v45 = vmul.f32 -1.442695, %v1176_v44 }
 0x488   : > { %1408 = vpow2.f32 %v1278_v45 }
 0x492   : > { %v1409_v46 = vpop.eup %1408 }
 0x493   : > { %v1180_v47 = vadd.f32 1.0, %v1409_v46 }
 0x495   : > { %1410 = vrcp.f32 %v1180_v47 }
 0x49f   : > { %v1411_v49 = vpop.eup %1410 }
 0x4a0   : > { %1184 = vst.msk [vmem:[%s303_s17] sm:$0x1] %vm1183_vm14, %v1411_v49 }
 0x4a1 PF: > { %s20_s29 = sadd.s32 1, %s1418_s29  }
 0x4a2   : > { %p17_p4 = scmp.ge.s32.totalorder %s20_s29, 4  }
 0x4a4   :  { %19 = sbr.rel (!%p17_p4) target bundleno = 3 (0x3), region = 82 }

</bundles_post_ra>
